<compile_context>
chip_gen: v7x
topology: tpu7x:2x2x1
jax: 0.10.0
libtpu: 0.0.40
codegen_flags: <defaults>
</compile_context>

<pallas_src>
import jax
import jax.numpy as jnp
from jax.experimental import pallas as pl
from jax.experimental.pallas import tpu as pltpu

# Model dims (from the PyTorch module). Input length must be 16 so that
# (16 - 3 + 1) // 2 == 7 and fc1 sees 16*7 = 112 features.
NUM_CLASSES = 1
C_OUT = 16
K = 3
L_IN = 16
L_CONV = L_IN - K + 1        # 14
L_POOL = L_CONV // 2         # 7
FLAT = C_OUT * L_POOL        # 112
H1 = 64
PAD = 128                    # lane-aligned width of each (even/odd) conv half
_SMALL_BATCH = 1024          # below this, a single full-batch tile (block == full array dims)


def _round_up(n, m):
    return (n + m - 1) // m * m


def simple_cnn_kernel(x_ref, wc_ref, bc_ref, w1_ref, b1_ref, w2_ref, b2_ref, o_ref):
    x = x_ref[...]
    if x.dtype != wc_ref.dtype:
        x = x.astype(wc_ref.dtype)               # in-kernel cast (no extra HBM pass over x)
    # conv as ONE matmul: (bt,16)@(16,256); even positions in lanes [0,128), odd in [128,256).
    conv = jnp.dot(x, wc_ref[...], preferred_element_type=jnp.float32) + bc_ref[...]
    # relu + maxpool(2) == relu(max(even, odd)) -> single VPU max chain (pad lanes stay 0).
    pooled = jnp.maximum(jnp.maximum(conv[:, :PAD], conv[:, PAD:]), 0.0)       # (bt,128)
    # fc1: (bt,128)@(128,64); zero pad rows/lanes contribute nothing.
    h = jnp.dot(pooled.astype(w1_ref.dtype), w1_ref[...],
                preferred_element_type=jnp.float32) + b1_ref[...]
    h = jnp.maximum(h, 0.0)                                                    # (bt,64)
    # fc2 (64 -> 1) as a transposed-RHS matmul so the result is lane-dense:
    #   w2 (8,64) [row 0 = fc2 weights, rows 1..7 zero]  X  h(bt,64)^T  ->  (8, bt)
    out8 = jax.lax.dot_general(w2_ref[...], h,
                               dimension_numbers=(((1,), (1,)), ((), ())),
                               preferred_element_type=jnp.float32)
    o_ref[...] = out8[0:1, :] + b2_ref[...]                                    # (1, bt)


def pack_params(params, matmul_dtype=jnp.float32):
    """Host-side glue: build the unfolded conv weight/bias and the fc weights.
    Call once and pass the result to simple_cnn_forward(..., packed=...)."""
    cw = jnp.asarray(params["conv_w"], jnp.float32)[:, 0, :]          # (16,3)
    cb = jnp.asarray(params["conv_b"], jnp.float32)                   # (16,)

    col = jnp.arange(FLAT)                                            # col = c*7 + j (PyTorch flatten order)
    c = col // L_POOL
    j = col % L_POOL
    i_idx = jnp.arange(L_IN)[:, None]                                 # (16,1) input position

    def unfolded(offset):
        # W[i, c*7+j] = conv_w[c, i - t] for t = 2*j + offset, zero elsewhere
        t = 2 * j + offset                                            # (112,)
        k = i_idx - t[None, :]                                        # (16,112)
        valid = (k >= 0) & (k < K)
        vals = cw[c[None, :], jnp.clip(k, 0, K - 1)]                  # (16,112)
        return jnp.where(valid, vals, 0.0)

    wc = jnp.zeros((L_IN, 2 * PAD), jnp.float32)
    wc = wc.at[:, :FLAT].set(unfolded(0)).at[:, PAD:PAD + FLAT].set(unfolded(1))
    bc = jnp.zeros((1, 2 * PAD), jnp.float32)
    bc = bc.at[0, :FLAT].set(cb[c]).at[0, PAD:PAD + FLAT].set(cb[c])

    w1 = jnp.zeros((PAD, H1), jnp.float32)
    w1 = w1.at[:FLAT, :].set(jnp.asarray(params["fc1_w"], jnp.float32).T)
    b1 = jnp.asarray(params["fc1_b"], jnp.float32).reshape(1, H1)
    w2 = jnp.zeros((8, H1), jnp.float32)                              # sublane-padded fc2 row
    w2 = w2.at[0, :].set(jnp.asarray(params["fc2_w"], jnp.float32).reshape(H1))
    b2 = jnp.asarray(params["fc2_b"], jnp.float32).reshape(1, NUM_CLASSES)
    return (wc.astype(matmul_dtype), bc, w1.astype(matmul_dtype), b1, w2, b2)


def simple_cnn_forward(x, params=None, *, block_b=4096, matmul_dtype=jnp.float32, packed=None):
    """x: (B, 16) float32 (or bfloat16 for the fast MXU path).  Returns (B, 1) float32.

    block_b: batch rows per grid step.  4096 (f32) fits comfortably on v5e/v6e/v7x; on v6e you
    can push 8192-16384, on v7x stay <= 8192 (64 MiB VMEM/TC) unless x/weights are bf16.
    """
    B = x.shape[0]
    assert x.shape[1] == L_IN, "SimpleCNN assumes input length 16 (fc1 is 16*7 wide)"
    if packed is None:
        packed = pack_params(params, matmul_dtype)
    wc, bc, w1, b1, w2, b2 = packed

    if B <= _SMALL_BATCH:
        bt = B                                   # single tile; block shape == full array dims
    else:
        # Tile is a multiple of 128 (keeps the (1,bt) output block lane-aligned) and at most
        # ~B/2 so the grid has >=2 steps (megacore sharding on v7x, DMA/compute pipelining).
        bt = min(_round_up(block_b, 128), _round_up(pl.cdiv(B, 2), 128))
    num_tiles = pl.cdiv(B, bt)                   # last tile may be partial -> Pallas masks it

    # Scale the scoped-VMEM limit with the tile (per-row live set ~3-4 KiB f32 + weights).
    vmem_limit = int(min(100 << 20, max(32 << 20, (4 << 20) + bt * 6 * 1024)))

    out_row = pl.pallas_call(
        simple_cnn_kernel,
        out_shape=jax.ShapeDtypeStruct((1, B), jnp.float32),
        grid=(num_tiles,),
        in_specs=[
            pl.BlockSpec((bt, L_IN), lambda i: (i, 0)),        # x batch tile
            pl.BlockSpec((L_IN, 2 * PAD), lambda i: (0, 0)),   # unfolded conv weight (16,256)
            pl.BlockSpec((1, 2 * PAD), lambda i: (0, 0)),      # conv bias (1,256)
            pl.BlockSpec((PAD, H1), lambda i: (0, 0)),         # fc1 weight (128,64)
            pl.BlockSpec((1, H1), lambda i: (0, 0)),           # fc1 bias
            pl.BlockSpec((8, H1), lambda i: (0, 0)),           # fc2 weight (row 0 live)
            pl.BlockSpec((1, NUM_CLASSES), lambda i: (0, 0)),  # fc2 bias
        ],
        out_specs=pl.BlockSpec((1, bt), lambda i: (0, i)),     # lane-dense output row
        compiler_params=pltpu.CompilerParams(
            dimension_semantics=("parallel",),                 # megacore batch sharding on v7x
            vmem_limit_bytes=vmem_limit,
        ),
    )(x, wc, bc, w1, b1, w2, b2)
    return out_row.reshape(B, NUM_CLASSES)


def reference_forward(x, params):
    """Pure-JAX replica of the PyTorch forward (for correctness checking)."""
    B = x.shape[0]
    windows = jnp.stack([x[:, t:t + K] for t in range(L_CONV)], axis=0)       # (14,B,3)
    conv = jnp.einsum("tbk,ck->bct", windows, params["conv_w"][:, 0, :])
    conv = conv + params["conv_b"][None, :, None]                             # (B,16,14)
    conv = jnp.maximum(conv, 0.0)
    pooled = jnp.max(conv.reshape(B, C_OUT, L_POOL, 2), axis=-1)              # (B,16,7)
    flat = pooled.reshape(B, C_OUT * L_POOL)                                  # (B,112)
    h = jnp.maximum(flat @ params["fc1_w"].T + params["fc1_b"], 0.0)          # (B,64)
    return h @ params["fc2_w"].T + params["fc2_b"]                            # (B,1)


if __name__ == "__main__":
    key = jax.random.PRNGKey(0)
    ks = jax.random.split(key, 7)
    params = {
        "conv_w": jax.random.normal(ks[0], (C_OUT, 1, K), jnp.float32) * 0.3,
        "conv_b": jax.random.normal(ks[1], (C_OUT,), jnp.float32) * 0.1,
        "fc1_w": jax.random.normal(ks[2], (H1, C_OUT * L_POOL), jnp.float32) * 0.1,
        "fc1_b": jax.random.normal(ks[3], (H1,), jnp.float32) * 0.1,
        "fc2_w": jax.random.normal(ks[4], (NUM_CLASSES, H1), jnp.float32) * 0.1,
        "fc2_b": jax.random.normal(ks[5], (NUM_CLASSES,), jnp.float32) * 0.1,
    }
    x = jax.random.normal(ks[6], (2, L_IN), jnp.float32)   # batch=2, seq=16

    packed = pack_params(params)                           # pack weights once, reuse per call
    out = simple_cnn_forward(x, params, packed=packed)
    out = jax.block_until_ready(out)
    ref = reference_forward(x, params)

    assert out.shape == (2, NUM_CLASSES), out.shape
    assert jnp.allclose(out, ref, rtol=1e-5, atol=1e-5), (out, ref)
    print("KERNEL_OK")
</pallas_src>

<mosaic_0001>
module attributes {stable_mosaic.version = 11 : i64} {
  func.func @simple_cnn_kernel(%arg0: i32, %arg1: memref<2x16xf32, #tpu.memory_space<vmem>>, %arg2: memref<16x256xf32, #tpu.memory_space<vmem>>, %arg3: memref<1x256xf32, #tpu.memory_space<vmem>>, %arg4: memref<128x64xf32, #tpu.memory_space<vmem>>, %arg5: memref<1x64xf32, #tpu.memory_space<vmem>>, %arg6: memref<8x64xf32, #tpu.memory_space<vmem>>, %arg7: memref<1x1xf32, #tpu.memory_space<vmem>>, %arg8: memref<1x2xf32, #tpu.memory_space<vmem>>) attributes {dimension_semantics = [#tpu.dimension_semantics<parallel>], iteration_bounds = array<i64: 1>, scalar_prefetch = 0 : i64, scratch_operands = 0 : i64, tpu.core_type = #tpu.core_type<tc>, window_params = [{transform_indices = @transform_0, window_bounds = array<i64: 2, 16>}, {pipeline_mode = #tpu.pipeline_mode<synchronous>, transform_indices = @transform_1, window_bounds = array<i64: 16, 256>}, {pipeline_mode = #tpu.pipeline_mode<synchronous>, transform_indices = @transform_2, window_bounds = array<i64: 1, 256>}, {pipeline_mode = #tpu.pipeline_mode<synchronous>, transform_indices = @transform_3, window_bounds = array<i64: 128, 64>}, {pipeline_mode = #tpu.pipeline_mode<synchronous>, transform_indices = @transform_4, window_bounds = array<i64: 1, 64>}, {pipeline_mode = #tpu.pipeline_mode<synchronous>, transform_indices = @transform_5, window_bounds = array<i64: 8, 64>}, {pipeline_mode = #tpu.pipeline_mode<synchronous>, transform_indices = @transform_6, window_bounds = array<i64: 1, 1>}, {transform_indices = @transform_7, window_bounds = array<i64: 1, 2>}]} {
    %c0 = arith.constant 0 : index
    %c0_0 = arith.constant 0 : index
    %0 = vector.load %arg1[%c0, %c0_0] : memref<2x16xf32, #tpu.memory_space<vmem>>, vector<2x16xf32>
    %c0_1 = arith.constant 0 : index
    %c0_2 = arith.constant 0 : index
    %1 = vector.load %arg2[%c0_1, %c0_2] : memref<16x256xf32, #tpu.memory_space<vmem>>, vector<16x256xf32>
    %cst = arith.constant dense<0.000000e+00> : vector<2x256xf32>
    %2 = tpu.matmul %0, %1, %cst {dimension_numbers = #tpu.dot_dimension_numbers<[1], [0], [0], [1], [0, 0, 1, 1], [], []>} : vector<2x16xf32>, vector<16x256xf32>, vector<2x256xf32> -> vector<2x256xf32>
    %c0_3 = arith.constant 0 : index
    %c0_4 = arith.constant 0 : index
    %3 = vector.load %arg3[%c0_3, %c0_4] : memref<1x256xf32, #tpu.memory_space<vmem>>, vector<1x256xf32>
    %4 = vector.broadcast %3 : vector<1x256xf32> to vector<2x256xf32>
    %5 = arith.addf %2, %4 : vector<2x256xf32>
    %6 = vector.extract_strided_slice %5 {offsets = [0, 0], sizes = [2, 128], strides = [1, 1]} : vector<2x256xf32> to vector<2x128xf32>
    %7 = vector.extract_strided_slice %5 {offsets = [0, 128], sizes = [2, 128], strides = [1, 1]} : vector<2x256xf32> to vector<2x128xf32>
    %8 = arith.maximumf %6, %7 : vector<2x128xf32>
    %cst_5 = arith.constant 0.000000e+00 : f32
    %9 = vector.broadcast %cst_5 : f32 to vector<2x128xf32>
    %10 = arith.maximumf %8, %9 : vector<2x128xf32>
    %c0_6 = arith.constant 0 : index
    %c0_7 = arith.constant 0 : index
    %11 = vector.load %arg4[%c0_6, %c0_7] : memref<128x64xf32, #tpu.memory_space<vmem>>, vector<128x64xf32>
    %cst_8 = arith.constant dense<0.000000e+00> : vector<2x64xf32>
    %12 = tpu.matmul %10, %11, %cst_8 {dimension_numbers = #tpu.dot_dimension_numbers<[1], [0], [0], [1], [0, 0, 1, 1], [], []>} : vector<2x128xf32>, vector<128x64xf32>, vector<2x64xf32> -> vector<2x64xf32>
    %c0_9 = arith.constant 0 : index
    %c0_10 = arith.constant 0 : index
    %13 = vector.load %arg5[%c0_9, %c0_10] : memref<1x64xf32, #tpu.memory_space<vmem>>, vector<1x64xf32>
    %14 = vector.broadcast %13 : vector<1x64xf32> to vector<2x64xf32>
    %15 = arith.addf %12, %14 : vector<2x64xf32>
    %cst_11 = arith.constant 0.000000e+00 : f32
    %16 = vector.broadcast %cst_11 : f32 to vector<2x64xf32>
    %17 = arith.maximumf %15, %16 : vector<2x64xf32>
    %c0_12 = arith.constant 0 : index
    %c0_13 = arith.constant 0 : index
    %18 = vector.load %arg6[%c0_12, %c0_13] : memref<8x64xf32, #tpu.memory_space<vmem>>, vector<8x64xf32>
    %cst_14 = arith.constant dense<0.000000e+00> : vector<8x2xf32>
    %19 = tpu.matmul %18, %17, %cst_14 {dimension_numbers = #tpu.dot_dimension_numbers<[1], [1], [0], [0], [0, 0, 1, 0], [], []>} : vector<8x64xf32>, vector<2x64xf32>, vector<8x2xf32> -> vector<8x2xf32>
    %20 = vector.extract_strided_slice %19 {offsets = [0, 0], sizes = [1, 2], strides = [1, 1]} : vector<8x2xf32> to vector<1x2xf32>
    %c0_15 = arith.constant 0 : index
    %c0_16 = arith.constant 0 : index
    %21 = vector.load %arg7[%c0_15, %c0_16] : memref<1x1xf32, #tpu.memory_space<vmem>>, vector<1x1xf32>
    %22 = vector.broadcast %21 : vector<1x1xf32> to vector<1x2xf32>
    %23 = arith.addf %20, %22 : vector<1x2xf32>
    %c0_17 = arith.constant 0 : index
    %c0_18 = arith.constant 0 : index
    %24 = vector.load %arg8[%c0_17, %c0_18] : memref<1x2xf32, #tpu.memory_space<vmem>>, vector<1x2xf32>
    tpu.vector_store %arg8[%c0_17, %c0_18], %23 {strides = array<i32>} : memref<1x2xf32, #tpu.memory_space<vmem>>, vector<1x2xf32>,
    return
  }
  func.func @transform_0(%arg0: i32) -> (i32, i32) {
    %c0_i32 = arith.constant 0 : i32
    %c0_i32_0 = arith.constant 0 : i32
    return %arg0, %c0_i32 : i32, i32
  }
  func.func @transform_1(%arg0: i32) -> (i32, i32) {
    %c0_i32 = arith.constant 0 : i32
    %c0_i32_0 = arith.constant 0 : i32
    %c0_i32_1 = arith.constant 0 : i32
    return %c0_i32, %c0_i32_0 : i32, i32
  }
  func.func @transform_2(%arg0: i32) -> (i32, i32) {
    %c0_i32 = arith.constant 0 : i32
    %c0_i32_0 = arith.constant 0 : i32
    %c0_i32_1 = arith.constant 0 : i32
    return %c0_i32, %c0_i32_0 : i32, i32
  }
  func.func @transform_3(%arg0: i32) -> (i32, i32) {
    %c0_i32 = arith.constant 0 : i32
    %c0_i32_0 = arith.constant 0 : i32
    %c0_i32_1 = arith.constant 0 : i32
    return %c0_i32, %c0_i32_0 : i32, i32
  }
  func.func @transform_4(%arg0: i32) -> (i32, i32) {
    %c0_i32 = arith.constant 0 : i32
    %c0_i32_0 = arith.constant 0 : i32
    %c0_i32_1 = arith.constant 0 : i32
    return %c0_i32, %c0_i32_0 : i32, i32
  }
  func.func @transform_5(%arg0: i32) -> (i32, i32) {
    %c0_i32 = arith.constant 0 : i32
    %c0_i32_0 = arith.constant 0 : i32
    %c0_i32_1 = arith.constant 0 : i32
    return %c0_i32, %c0_i32_0 : i32, i32
  }
  func.func @transform_6(%arg0: i32) -> (i32, i32) {
    %c0_i32 = arith.constant 0 : i32
    %c0_i32_0 = arith.constant 0 : i32
    %c0_i32_1 = arith.constant 0 : i32
    return %c0_i32, %c0_i32_0 : i32, i32
  }
  func.func @transform_7(%arg0: i32) -> (i32, i32) {
    %c0_i32 = arith.constant 0 : i32
    %c0_i32_0 = arith.constant 0 : i32
    return %c0_i32, %arg0 : i32, i32
  }
}

</mosaic_0001>

<bundles_post_ra>
// kernel: tpu_custom_call.1
= control target key start
LH: loop header
LB: loop body
LE: loop exit
PB: predicated region body
PF: predicated region fallthrough
CT: control target
= control target key end

     0   :  { %s575_s0 = inlined_call_operand.vmem [shape: f32[2,16], index: 0, kind: input, shape index: {}]   ;;  %s576_s1 = inlined_call_operand.vmem [shape: f32[16,256], index: 1, kind: input, shape index: {}]   ;;  %s577_s2 = inlined_call_operand.vmem [shape: f32[1,256], index: 2, kind: input, shape index: {}]   ;;  %s578_s3 = inlined_call_operand.vmem [shape: f32[128,64], index: 3, kind: input, shape index: {}]   ;;  %s579_s4 = inlined_call_operand.vmem [shape: f32[1,64], index: 4, kind: input, shape index: {}]   ;;  %s580_s5 = inlined_call_operand.vmem [shape: f32[8,64], index: 5, kind: input, shape index: {}]   ;;  %s581_s6 = inlined_call_operand.<no memory space> [shape: f32[1,1], index: 6, kind: input, shape index: {}]   ;;  %s582_s7 = inlined_call_operand.hbm [shape: f32[1,2], index: 7, kind: output, shape index: {}]  }
   0x1   :  { %v12_v0 = vstv %s581_s6 }
   0x2   :  { %13 = vst [vmem:[#allocation2] sm:$0x1] %v12_v0 }
   0x3   :  { %v31_v1 = vld [vmem:[%s576_s1 + $0x8] sm:$0xff]  ;;  %v33_v2 = vld [vmem:[%s576_s1 + $0x18] sm:$0xff]  ;;  %v30_v3 = vld [vmem:[%s576_s1] sm:$0xff]  ;;  %v443_v6 = vmov 0.0   ;;  %v444_v7 = vmov 0.0|0.0   ;;  %vm46_vm0 = vcmask 130048  }
   0x4   :  { %v385_v4 = vpack.c.bf16 %v33_v2, %v31_v1  ;;  %v32_v5 = vld [vmem:[%s576_s1 + $0x10] sm:$0xff]  ;;  %114 = vmatprep.mubr.f32.mxu0 %v443_v6  ;;  %389 = vmatprep.subr.bf16.mxu1 %v444_v7  ;;  %v123_v8 = vld [vmem:[%s578_s3] sm:$0xff]  ;;  %v124_v10 = vld [vmem:[%s578_s3 + $0x8] sm:$0xff] }
   0x5   :  { %v387_v9 = vpack.c.bf16 %v32_v5, %v30_v3  ;;  %v125_v11 = vld [vmem:[%s578_s3 + $0x10] sm:$0xff]  ;;  %v126_v12 = vld [vmem:[%s578_s3 + $0x18] sm:$0xff]  ;;  %v390_v13 = vpack.c.bf16 %v124_v10, %v123_v8  ;;  %v29_v14 = vld [vmem:[%s575_s0] sm:$0x3] }
   0x6   :  { %386 = vmatprep.subr.bf16.mxu0 %v385_v4  ;;  %v393_v15 = vpack.c.bf16 %v126_v12, %v125_v11  ;;  %v127_v16 = vld [vmem:[%s578_s3 + $0x20] sm:$0xff]  ;;  %v128_v17 = vld [vmem:[%s578_s3 + $0x28] sm:$0xff] }
   0x7   :  { %388 = vmatpush1.bf16.msra.mxu0 %v387_v9  ;;  %391 = vmatpush3.bf16.msra.mxu1 %v390_v13 }
   0x8   :  { %380 = vmatprep.subr.mxu0 %v443_v6  ;;  %392 = vmatprep.subr.bf16.mxu1 %v444_v7 }
   0x9   :  { %14 = vsyncpa [#allocation4], 0  ;;  %v396_v18 = vpack.c.bf16 %v128_v17, %v127_v16  ;;  %v129_v19 = vld [vmem:[%s578_s3 + $0x30] sm:$0xff]  ;;  %v130_v20 = vld [vmem:[%s578_s3 + $0x38] sm:$0xff]  ;;  %vm445_vm1 = vmmov 0   ;;  %v36_v34 = vlaneseq  ;;  %v446_v48 = vmov 0  }
   0xa   :  { %322 = vmatmul.mubr.msk.f32.vlgmr.msra.gmra.mrb[0].mxu0 %vm46_vm0, %v29_v14  ;;  %v399_v21 = vpack.c.bf16 %v130_v20, %v129_v19  ;;  %v131_v22 = vld [vmem:[%s578_s3 + $0x40] sm:$0xff]  ;;  %v132_v23 = vld [vmem:[%s578_s3 + $0x48] sm:$0xff]  ;;  %v133_v25 = vld [vmem:[%s578_s3 + $0x50] sm:$0xff]  ;;  %377 = vmatprep.mubr.msk.f32.mxu1 %vm445_vm1, %v443_v6  ;;  %vm218_vm2 = vcmask 523264   ;;  %s447_s21 = smov [#allocation3]   ;;  %vm306_vm3 = vcmask 8192  }
   0xb   :  { %394 = vmatpush3.bf16.msra.mxu1 %v393_v15  ;;  %v402_v24 = vpack.c.bf16 %v132_v23, %v131_v22  ;;  %v134_v26 = vld [vmem:[%s578_s3 + $0x58] sm:$0xff]  ;;  %v135_v28 = vld [vmem:[%s578_s3 + $0x60] sm:$0xff]  ;;  %v136_v29 = vld [vmem:[%s578_s3 + $0x68] sm:$0xff]  ;;  %382 = vmatprep.mubr.msk.f32.mxu0 %vm445_vm1, %v443_v6  ;;  %v37_v35 = vshrl.u32 %v36_v34, 7  ;;  %s314_s22 = sshll.u32 %s447_s21, 4  ;;  %s315_s22 = int_to_ptr.vmem [resolvable:$true] %s314_s22 }
   0xc   :  { %395 = vmatprep.subr.bf16.mxu1 %v444_v7  ;;  %v405_v27 = vpack.c.bf16 %v134_v26, %v133_v25  ;;  %v408_v30 = vpack.c.bf16 %v136_v29, %v135_v28  ;;  %v137_v31 = vld [vmem:[%s578_s3 + $0x70] sm:$0xff]  ;;  %v138_v32 = vld [vmem:[%s578_s3 + $0x78] sm:$0xff]  ;;  %v34_v37 = vld [vmem:[%s577_s2] sm:$0x3]  ;;  %418 = vset.pattern.permute.xlu0 %v446_v48  ;;  %s423_s23 = scalar_lea.vmem %s315_s22, 32  ;;  %p424_p1 = scmp.lt.s32.totalorder %s315_s22, %s315_s22 }
   0xd   :  { %v411_v33 = vpack.c.bf16 %v138_v32, %v137_v31  ;;  %v38_v36 = vsub.s32 0, %v37_v35  ;;  %v42_v38 = vsub.s32 1, %v37_v35  ;;  %v295_v47 = vld [vmem:[#allocation2] sm:$0x1] }
   0xe   :  { %298 = vperm.xlu0 %418, %v295_v47   ;;  %v323_v49 = vld [vmem:[%s579_s4] ss:$0 sm:$0xff]  ;;  %s419_s4 = scalar_lea.vmem %s315_s22, 16 }
   0xf   :  { %397 = vmatpush3.bf16.msra.mxu1 %v396_v18  ;;  %v39_v39 = vrot.slane %v34_v37, %v38_v36  ;;  %v43_v40 = vrot.slane %v34_v37, %v42_v38  ;;  %v217_v54 = vld [vmem:[%s580_s5] sm:$0xff]  ;;  %p420_p0 = scmp.ne.s32.totalorder %s315_s22, %s419_s4  ;;  %p425_p2 = scmp.lt.s32.totalorder %s423_s23, %s419_s4 }
  0x10   :  { %398 = vmatprep.subr.bf16.mxu1 %v444_v7 }
  0x11   :  { %p426_p3 = por %p425_p2, %p424_p1 }
  0x13   :  { %400 = vmatpush3.bf16.msra.mxu1 %v399_v21  ;;  %p427_p4 = pnand %p426_p3, %p420_p0 }
  0x14   :  { %401 = vmatprep.subr.bf16.mxu1 %v444_v7 }
  0x17   :  { %403 = vmatpush3.bf16.msra.mxu1 %v402_v24 }
  0x18   :  { %404 = vmatprep.subr.bf16.mxu1 %v444_v7 }
  0x1b   :  { %406 = vmatpush3.bf16.msra.mxu1 %v405_v27 }
  0x1c   :  { %407 = vmatprep.subr.bf16.mxu1 %v444_v7 }
  0x1f   :  { %409 = vmatpush3.bf16.msra.mxu1 %v408_v30 }
  0x20   :  { %410 = vmatprep.subr.bf16.mxu1 %v444_v7 }
  0x23   :  { %412 = vmatpush3.bf16.msra.mxu1 %v411_v33 }
  0x8d   :  { %v299_v55 = vpop.permute.xlu0 %298 }
  0x8e   :  { %v304_v56 = vrot.slane %v299_v55, %v38_v36 }
  0xdd   :  { %v116_v41 = vpop.f32.mrb[0].mxu0 }
  0xde   :  { %v117_v42 = vadd.f32 %v116_v41, %v39_v39  ;;  %v118_v43 = vpop.f32.mrb[1].mxu0 }
  0xdf   :  { %v119_v44 = vadd.f32 %v118_v43, %v43_v40 }
  0xe1   :  { %v121_v45 = vmax.f32 %v117_v42, %v119_v44 }
  0xe3   :  { %v122_v46 = vmax.f32 %v121_v45, 0.0 }
  0xe5   :  { %378 = vmatmul.mubr.f32.vlgmr.msra.gmra.mrb[0].mxu1 %v122_v46 }
 0x1b8   :  { %v212_v50 = vpop.f32.mrb[0].mxu1 }
 0x1b9   :  { %v213_v51 = vadd.f32 %v323_v49, %v212_v50  ;;  %v379_v52 = vpop.f32.mrb[1].mxu1 }
 0x1bb   :  { %v216_v53 = vmax.f32 %v213_v51, 0.0 }
 0x1bd   :  { %381 = vmatpush3.xpose.msk.msra.mxu0 %vm218_vm2, %v216_v53 }
 0x1c0   :  { %383 = vmatmul.mubr.msk.f32.vlgmr.msra.gmra.mrb[2].mxu0 %vm218_vm2, %v217_v54 }
 0x293   :  { %v291_v57 = vpop.f32.mrb[2].mxu0 }
 0x294   :  { %v305_v58 = vadd.f32 %v304_v56, %v291_v57  ;;  %v384_v59 = vpop.f32.mrb[3].mxu0 }
 0x296   :  { %307 = vst.msk [vmem:[#allocation3] sm:$0x1] %vm306_vm3, %v305_v58 }
 0x297   :  { %430 = shalt.err (!%p427_p4)
}
 0x298   :  { %s431_s24 = scalar_lea.hbm %s582_s7, 16 }
 0x299   :  { %p432_p5 = scmp.ne.s32.totalorder %s582_s7, %s431_s24  ;;  %p435_p6 = scmp.lt.u32.totalorder %s431_s24, %s582_s7 }
 0x29b   :  { %p437_p7 = pnand %p435_p6, %p432_p5 }
 0x29d   :  { %440 = shalt.err (!%p437_p7)
}
 0x29e   :  { %317 = dma.vmem_to_hbm [thread:$0]  %s315_s22, 16, %s582_s7, [#allocation4]  }
 0x29f   :  { %441 = dma.done.wait [#allocation4], 16  }
 0x2a0   :  { %442 = vsyncadd [#allocation4], 4294967280 }
 0x2a1   :  { %321 = vsyncpa [#allocation4], 1 }

</bundles_post_ra>
